<compile_context>
chip_gen: v7x
topology: tpu7x:2x2x1
jax: 0.10.0
libtpu: 0.0.40
codegen_flags: <defaults>
</compile_context>

<pallas_src>
import functools

import numpy as np

import jax
import jax.numpy as jnp
from jax import lax
from jax.experimental import pallas as pl
from jax.experimental.pallas import tpu as pltpu


def _make_input_masks(H, W):
    """(9, H*W) f32 validity masks for the 3x3 zero-padded conv.

    Mask for tap k = dy*3+dx is expressed in *input* coordinates (already
    rolled by the tap offset), so the kernel can apply all 9 masks with a
    single (9, HW) elementwise multiply before rolling the tap rows.
    """
    HW = H * W
    ys = np.arange(HW) // W
    xs = np.arange(HW) % W
    masks = np.empty((9, HW), np.float32)
    for dy in range(3):
        for dx in range(3):
            k = dy * 3 + dx
            valid = ((ys + dy - 1 >= 0) & (ys + dy - 1 < H) &
                     (xs + dx - 1 >= 0) & (xs + dx - 1 < W))
            off = (dy - 1) * W + (dx - 1)
            # mask_in[q] = mask_out[q - off]  (so roll(taps*mask_in, -off)
            # equals roll(taps, -off) * mask_out).
            masks[k] = np.roll(valid.astype(np.float32), off)
    return masks


def _bigate_kernel(mask_ref, w1_ref, w2_ref, b1_ref, b2_ref,   # params
                   f1_ref, f2_ref,                             # (B, C, HW)
                   o1_ref, o2_ref,                             # (B, C, HW)
                   *, W, HW, B):
    offs = tuple((dy - 1) * W + (dx - 1) for dy in range(3) for dx in range(3))

    masks = mask_ref[...]            # (9, HW) f32, hoisted once per call
    w1 = w1_ref[...]                 # (9, C1) f32
    w2 = w2_ref[...]                 # (9, C2) f32
    bias1 = b1_ref[0]
    bias2 = b2_ref[0]

    def conv3x3_to_1(x, w_mat, bias):
        """Conv2d(C, 1, 3, padding=1) on a flattened (C, HW) map -> (1, HW)."""
        # All 9 taps' channel contractions in one MXU matmul (f32 accumulate).
        taps = jnp.dot(w_mat, x,
                       preferred_element_type=jnp.float32,
                       precision=jax.lax.Precision.HIGHEST)     # (9, HW)
        # One full-sublane multiply applies all boundary masks at once.
        masked = taps * masks                                    # (9, HW)
        rows = []
        for k, off in enumerate(offs):
            r = masked[k:k + 1, :]                               # (1, HW)
            if off != 0:
                # result[p] = masked[k, p + off]; wrap-around lanes are
                # already zeroed by the (input-coordinate) mask.
                r = pltpu.roll(r, shift=(-off) % HW, axis=1)
            rows.append(r)
        # Balanced tree sum of the 9 taps (short dependency chains).
        while len(rows) > 1:
            nxt = [rows[i] + rows[i + 1] for i in range(0, len(rows) - 1, 2)]
            if len(rows) % 2:
                nxt.append(rows[-1])
            rows = nxt
        return rows[0] + bias

    # Whole batch in one grid step; B is small and statically unrolled.
    for b in range(B):
        x1 = f1_ref[b].astype(jnp.float32)     # (C1, HW)
        x2 = f2_ref[b].astype(jnp.float32)     # (C2, HW)

        acc1 = conv3x3_to_1(x1, w1, bias1)     # b_conv2d(feat1) -> (1, HW)
        acc2 = conv3x3_to_1(x2, w2, bias2)     # a_conv2d(feat2) -> (1, HW)

        feat1_scale = jax.nn.sigmoid(acc1)
        feat2_scale = jax.nn.sigmoid(acc2)

        # Cross gating, exactly as in the PyTorch forward.
        o1_ref[b] = (x1 * feat2_scale).astype(o1_ref.dtype)
        o2_ref[b] = (x2 * feat1_scale).astype(o2_ref.dtype)


def bigate_pallas(feat1, feat2, w1, b1, w2, b2):
    """feat1: (B, C1, H, W), feat2: (B, C2, H, W) — NCHW like PyTorch."""
    B, C1, H, W = feat1.shape
    _, C2, _, _ = feat2.shape
    HW = H * W

    # Free, contiguous reshapes -> lane-dense (..., H*W) layout. No padding copy.
    f1 = feat1.reshape(B, C1, HW)
    f2 = feat2.reshape(B, C2, HW)

    # (9, C) weight matrices for the MXU contraction: w_mat[k, c] = w[c, dy, dx]
    # with k = dy*3 + dx.
    w1m = jnp.transpose(w1.reshape(C1, 9)).astype(jnp.float32)
    w2m = jnp.transpose(w2.reshape(C2, 9)).astype(jnp.float32)
    b1f = b1.reshape(-1).astype(jnp.float32)
    b2f = b2.reshape(-1).astype(jnp.float32)

    # Host-precomputed halo masks (static in H, W).
    masks = jnp.asarray(_make_input_masks(H, W))

    vmem = pl.BlockSpec(memory_space=pltpu.MemorySpace.VMEM)
    smem = pl.BlockSpec(memory_space=pltpu.MemorySpace.SMEM)
    kernel = functools.partial(_bigate_kernel, W=W, HW=HW, B=B)

    o1, o2 = pl.pallas_call(
        kernel,
        out_shape=(
            jax.ShapeDtypeStruct((B, C1, HW), feat1.dtype),
            jax.ShapeDtypeStruct((B, C2, HW), feat2.dtype),
        ),
        in_specs=[
            vmem,   # masks (9, HW)
            vmem,   # w1m   (9, C1)
            vmem,   # w2m   (9, C2)
            smem,   # b1    (1,)
            smem,   # b2    (1,)
            vmem,   # feat1 (B, C1, HW)
            vmem,   # feat2 (B, C2, HW)
        ],
        out_specs=(vmem, vmem),
    )(masks, w1m, w2m, b1f, b2f, f1, f2)

    return o1.reshape(B, C1, H, W), o2.reshape(B, C2, H, W)


def bigate_reference(feat1, feat2, w1, b1, w2, b2):
    """Pure-JAX reference (NCHW conv) matching the PyTorch module."""
    def conv(x, w, b):
        y = lax.conv_general_dilated(
            x, w[None], window_strides=(1, 1), padding=((1, 1), (1, 1)),
            dimension_numbers=("NCHW", "OIHW", "NCHW"),
            precision=jax.lax.Precision.HIGHEST)
        return y + b.reshape(1, 1, 1, 1)

    feat1_scale = jax.nn.sigmoid(conv(feat1, w1, b1))
    feat2_scale = jax.nn.sigmoid(conv(feat2, w2, b2))
    return feat1 * feat2_scale, feat2 * feat1_scale


if __name__ == "__main__":
    g_channel, g_channel_ = 4, 6
    B, H, W = 2, 16, 16

    key = jax.random.PRNGKey(0)
    k1, k2, k3, k4, k5, k6 = jax.random.split(key, 6)

    feat1 = jax.random.normal(k1, (B, g_channel, H, W), jnp.float32)
    feat2 = jax.random.normal(k2, (B, g_channel_, H, W), jnp.float32)

    # Deterministic "Conv2d(C, 1, 3, padding=1)" parameters.
    w1 = 0.1 * jax.random.normal(k3, (g_channel, 3, 3), jnp.float32)   # b_conv2d weight
    b1 = 0.1 * jax.random.normal(k4, (1,), jnp.float32)                # b_conv2d bias
    w2 = 0.1 * jax.random.normal(k5, (g_channel_, 3, 3), jnp.float32)  # a_conv2d weight
    b2 = 0.1 * jax.random.normal(k6, (1,), jnp.float32)                # a_conv2d bias

    out1, out2 = bigate_pallas(feat1, feat2, w1, b1, w2, b2)
    out1 = jax.block_until_ready(out1)
    out2 = jax.block_until_ready(out2)

    ref1, ref2 = bigate_reference(feat1, feat2, w1, b1, w2, b2)
    assert jnp.allclose(out1, ref1, atol=1e-5, rtol=1e-5), "out1 mismatch"
    assert jnp.allclose(out2, ref2, atol=1e-5, rtol=1e-5), "out2 mismatch"

    print("KERNEL_OK")
</pallas_src>

<mosaic_0001>
module attributes {stable_mosaic.version = 11 : i64} {
  func.func @_bigate_kernel(%arg0: memref<9x256xf32, #tpu.memory_space<vmem>>, %arg1: memref<9x4xf32, #tpu.memory_space<vmem>>, %arg2: memref<9x6xf32, #tpu.memory_space<vmem>>, %arg3: memref<1xf32, #tpu.memory_space<smem>>, %arg4: memref<1xf32, #tpu.memory_space<smem>>, %arg5: memref<2x4x256xf32, #tpu.memory_space<vmem>>, %arg6: memref<2x6x256xf32, #tpu.memory_space<vmem>>, %arg7: memref<2x4x256xf32, #tpu.memory_space<vmem>>, %arg8: memref<2x6x256xf32, #tpu.memory_space<vmem>>) attributes {dimension_semantics = [], scalar_prefetch = 0 : i64, scratch_operands = 0 : i64, tpu.core_type = #tpu.core_type<tc>} {
    %c0 = arith.constant 0 : index
    %c0_0 = arith.constant 0 : index
    %0 = vector.load %arg0[%c0, %c0_0] : memref<9x256xf32, #tpu.memory_space<vmem>>, vector<9x256xf32>
    %c0_1 = arith.constant 0 : index
    %c0_2 = arith.constant 0 : index
    %1 = vector.load %arg1[%c0_1, %c0_2] : memref<9x4xf32, #tpu.memory_space<vmem>>, vector<9x4xf32>
    %c0_3 = arith.constant 0 : index
    %c0_4 = arith.constant 0 : index
    %2 = vector.load %arg2[%c0_3, %c0_4] : memref<9x6xf32, #tpu.memory_space<vmem>>, vector<9x6xf32>
    %c0_5 = arith.constant 0 : index
    %3 = memref.load %arg3[%c0_5] : memref<1xf32, #tpu.memory_space<smem>>
    %c0_6 = arith.constant 0 : index
    %4 = memref.load %arg4[%c0_6] : memref<1xf32, #tpu.memory_space<smem>>
    %c0_7 = arith.constant 0 : index
    %c0_8 = arith.constant 0 : index
    %c0_9 = arith.constant 0 : index
    %5 = vector.load %arg5[%c0_7, %c0_8, %c0_9] : memref<2x4x256xf32, #tpu.memory_space<vmem>>, vector<1x4x256xf32>
    %6 = vector.shape_cast %5 : vector<1x4x256xf32> to vector<4x256xf32>
    %c0_10 = arith.constant 0 : index
    %c0_11 = arith.constant 0 : index
    %c0_12 = arith.constant 0 : index
    %7 = vector.load %arg6[%c0_10, %c0_11, %c0_12] : memref<2x6x256xf32, #tpu.memory_space<vmem>>, vector<1x6x256xf32>
    %8 = vector.shape_cast %7 : vector<1x6x256xf32> to vector<6x256xf32>
    %cst = arith.constant dense<0.000000e+00> : vector<9x256xf32>
    %9 = tpu.matmul %1, %6, %cst {dimension_numbers = #tpu.dot_dimension_numbers<[1], [0], [0], [1], [0, 0, 1, 1], [], []>, precision = #tpu.contract_precision<fp32>} : vector<9x4xf32>, vector<4x256xf32>, vector<9x256xf32> -> vector<9x256xf32>
    %10 = arith.mulf %9, %0 : vector<9x256xf32>
    %11 = vector.extract_strided_slice %10 {offsets = [0, 0], sizes = [1, 256], strides = [1, 1]} : vector<9x256xf32> to vector<1x256xf32>
    %c17_i32 = arith.constant 17 : i32
    %12 = tpu.dynamic_rotate %11 by %c17_i32 dim 1 : vector<1x256xf32>, i32 -> vector<1x256xf32>
    %13 = vector.extract_strided_slice %10 {offsets = [1, 0], sizes = [1, 256], strides = [1, 1]} : vector<9x256xf32> to vector<1x256xf32>
    %c16_i32 = arith.constant 16 : i32
    %14 = tpu.dynamic_rotate %13 by %c16_i32 dim 1 : vector<1x256xf32>, i32 -> vector<1x256xf32>
    %15 = vector.extract_strided_slice %10 {offsets = [2, 0], sizes = [1, 256], strides = [1, 1]} : vector<9x256xf32> to vector<1x256xf32>
    %c15_i32 = arith.constant 15 : i32
    %16 = tpu.dynamic_rotate %15 by %c15_i32 dim 1 : vector<1x256xf32>, i32 -> vector<1x256xf32>
    %17 = vector.extract_strided_slice %10 {offsets = [3, 0], sizes = [1, 256], strides = [1, 1]} : vector<9x256xf32> to vector<1x256xf32>
    %c1_i32 = arith.constant 1 : i32
    %18 = tpu.dynamic_rotate %17 by %c1_i32 dim 1 : vector<1x256xf32>, i32 -> vector<1x256xf32>
    %19 = vector.extract_strided_slice %10 {offsets = [4, 0], sizes = [1, 256], strides = [1, 1]} : vector<9x256xf32> to vector<1x256xf32>
    %20 = vector.extract_strided_slice %10 {offsets = [5, 0], sizes = [1, 256], strides = [1, 1]} : vector<9x256xf32> to vector<1x256xf32>
    %c255_i32 = arith.constant 255 : i32
    %21 = tpu.dynamic_rotate %20 by %c255_i32 dim 1 : vector<1x256xf32>, i32 -> vector<1x256xf32>
    %22 = vector.extract_strided_slice %10 {offsets = [6, 0], sizes = [1, 256], strides = [1, 1]} : vector<9x256xf32> to vector<1x256xf32>
    %c241_i32 = arith.constant 241 : i32
    %23 = tpu.dynamic_rotate %22 by %c241_i32 dim 1 : vector<1x256xf32>, i32 -> vector<1x256xf32>
    %24 = vector.extract_strided_slice %10 {offsets = [7, 0], sizes = [1, 256], strides = [1, 1]} : vector<9x256xf32> to vector<1x256xf32>
    %c240_i32 = arith.constant 240 : i32
    %25 = tpu.dynamic_rotate %24 by %c240_i32 dim 1 : vector<1x256xf32>, i32 -> vector<1x256xf32>
    %26 = vector.extract_strided_slice %10 {offsets = [8, 0], sizes = [1, 256], strides = [1, 1]} : vector<9x256xf32> to vector<1x256xf32>
    %c239_i32 = arith.constant 239 : i32
    %27 = tpu.dynamic_rotate %26 by %c239_i32 dim 1 : vector<1x256xf32>, i32 -> vector<1x256xf32>
    %28 = arith.addf %12, %14 : vector<1x256xf32>
    %29 = arith.addf %16, %18 : vector<1x256xf32>
    %30 = arith.addf %19, %21 : vector<1x256xf32>
    %31 = arith.addf %23, %25 : vector<1x256xf32>
    %32 = arith.addf %28, %29 : vector<1x256xf32>
    %33 = arith.addf %30, %31 : vector<1x256xf32>
    %34 = arith.addf %32, %33 : vector<1x256xf32>
    %35 = arith.addf %34, %27 : vector<1x256xf32>
    %36 = vector.broadcast %3 : f32 to vector<1x256xf32>
    %37 = arith.addf %35, %36 : vector<1x256xf32>
    %cst_13 = arith.constant dense<0.000000e+00> : vector<9x256xf32>
    %38 = tpu.matmul %2, %8, %cst_13 {dimension_numbers = #tpu.dot_dimension_numbers<[1], [0], [0], [1], [0, 0, 1, 1], [], []>, precision = #tpu.contract_precision<fp32>} : vector<9x6xf32>, vector<6x256xf32>, vector<9x256xf32> -> vector<9x256xf32>
    %39 = arith.mulf %38, %0 : vector<9x256xf32>
    %40 = vector.extract_strided_slice %39 {offsets = [0, 0], sizes = [1, 256], strides = [1, 1]} : vector<9x256xf32> to vector<1x256xf32>
    %c17_i32_14 = arith.constant 17 : i32
    %41 = tpu.dynamic_rotate %40 by %c17_i32_14 dim 1 : vector<1x256xf32>, i32 -> vector<1x256xf32>
    %42 = vector.extract_strided_slice %39 {offsets = [1, 0], sizes = [1, 256], strides = [1, 1]} : vector<9x256xf32> to vector<1x256xf32>
    %c16_i32_15 = arith.constant 16 : i32
    %43 = tpu.dynamic_rotate %42 by %c16_i32_15 dim 1 : vector<1x256xf32>, i32 -> vector<1x256xf32>
    %44 = vector.extract_strided_slice %39 {offsets = [2, 0], sizes = [1, 256], strides = [1, 1]} : vector<9x256xf32> to vector<1x256xf32>
    %c15_i32_16 = arith.constant 15 : i32
    %45 = tpu.dynamic_rotate %44 by %c15_i32_16 dim 1 : vector<1x256xf32>, i32 -> vector<1x256xf32>
    %46 = vector.extract_strided_slice %39 {offsets = [3, 0], sizes = [1, 256], strides = [1, 1]} : vector<9x256xf32> to vector<1x256xf32>
    %c1_i32_17 = arith.constant 1 : i32
    %47 = tpu.dynamic_rotate %46 by %c1_i32_17 dim 1 : vector<1x256xf32>, i32 -> vector<1x256xf32>
    %48 = vector.extract_strided_slice %39 {offsets = [4, 0], sizes = [1, 256], strides = [1, 1]} : vector<9x256xf32> to vector<1x256xf32>
    %49 = vector.extract_strided_slice %39 {offsets = [5, 0], sizes = [1, 256], strides = [1, 1]} : vector<9x256xf32> to vector<1x256xf32>
    %c255_i32_18 = arith.constant 255 : i32
    %50 = tpu.dynamic_rotate %49 by %c255_i32_18 dim 1 : vector<1x256xf32>, i32 -> vector<1x256xf32>
    %51 = vector.extract_strided_slice %39 {offsets = [6, 0], sizes = [1, 256], strides = [1, 1]} : vector<9x256xf32> to vector<1x256xf32>
    %c241_i32_19 = arith.constant 241 : i32
    %52 = tpu.dynamic_rotate %51 by %c241_i32_19 dim 1 : vector<1x256xf32>, i32 -> vector<1x256xf32>
    %53 = vector.extract_strided_slice %39 {offsets = [7, 0], sizes = [1, 256], strides = [1, 1]} : vector<9x256xf32> to vector<1x256xf32>
    %c240_i32_20 = arith.constant 240 : i32
    %54 = tpu.dynamic_rotate %53 by %c240_i32_20 dim 1 : vector<1x256xf32>, i32 -> vector<1x256xf32>
    %55 = vector.extract_strided_slice %39 {offsets = [8, 0], sizes = [1, 256], strides = [1, 1]} : vector<9x256xf32> to vector<1x256xf32>
    %c239_i32_21 = arith.constant 239 : i32
    %56 = tpu.dynamic_rotate %55 by %c239_i32_21 dim 1 : vector<1x256xf32>, i32 -> vector<1x256xf32>
    %57 = arith.addf %41, %43 : vector<1x256xf32>
    %58 = arith.addf %45, %47 : vector<1x256xf32>
    %59 = arith.addf %48, %50 : vector<1x256xf32>
    %60 = arith.addf %52, %54 : vector<1x256xf32>
    %61 = arith.addf %57, %58 : vector<1x256xf32>
    %62 = arith.addf %59, %60 : vector<1x256xf32>
    %63 = arith.addf %61, %62 : vector<1x256xf32>
    %64 = arith.addf %63, %56 : vector<1x256xf32>
    %65 = vector.broadcast %4 : f32 to vector<1x256xf32>
    %66 = arith.addf %64, %65 : vector<1x256xf32>
    %67 = arith.negf %37 : vector<1x256xf32>
    %68 = math.exp %67 : vector<1x256xf32>
    %cst_22 = arith.constant 1.000000e+00 : f32
    %69 = vector.broadcast %cst_22 : f32 to vector<1x256xf32>
    %70 = arith.addf %69, %68 : vector<1x256xf32>
    %71 = arith.divf %69, %70 : vector<1x256xf32>
    %72 = arith.negf %66 : vector<1x256xf32>
    %73 = math.exp %72 : vector<1x256xf32>
    %cst_23 = arith.constant 1.000000e+00 : f32
    %74 = vector.broadcast %cst_23 : f32 to vector<1x256xf32>
    %75 = arith.addf %74, %73 : vector<1x256xf32>
    %76 = arith.divf %74, %75 : vector<1x256xf32>
    %77 = vector.broadcast %76 : vector<1x256xf32> to vector<4x256xf32>
    %78 = arith.mulf %6, %77 : vector<4x256xf32>
    %c0_24 = arith.constant 0 : index
    %c0_25 = arith.constant 0 : index
    %c0_26 = arith.constant 0 : index
    %79 = vector.load %arg7[%c0_24, %c0_25, %c0_26] : memref<2x4x256xf32, #tpu.memory_space<vmem>>, vector<1x4x256xf32>
    %80 = vector.shape_cast %79 : vector<1x4x256xf32> to vector<4x256xf32>
    %81 = vector.shape_cast %78 : vector<4x256xf32> to vector<1x4x256xf32>
    tpu.vector_store %arg7[%c0_24, %c0_25, %c0_26], %81 {strides = array<i32>} : memref<2x4x256xf32, #tpu.memory_space<vmem>>, vector<1x4x256xf32>,
    %82 = vector.broadcast %71 : vector<1x256xf32> to vector<6x256xf32>
    %83 = arith.mulf %8, %82 : vector<6x256xf32>
    %c0_27 = arith.constant 0 : index
    %c0_28 = arith.constant 0 : index
    %c0_29 = arith.constant 0 : index
    %84 = vector.load %arg8[%c0_27, %c0_28, %c0_29] : memref<2x6x256xf32, #tpu.memory_space<vmem>>, vector<1x6x256xf32>
    %85 = vector.shape_cast %84 : vector<1x6x256xf32> to vector<6x256xf32>
    %86 = vector.shape_cast %83 : vector<6x256xf32> to vector<1x6x256xf32>
    tpu.vector_store %arg8[%c0_27, %c0_28, %c0_29], %86 {strides = array<i32>} : memref<2x6x256xf32, #tpu.memory_space<vmem>>, vector<1x6x256xf32>,
    %c1 = arith.constant 1 : index
    %c0_30 = arith.constant 0 : index
    %c0_31 = arith.constant 0 : index
    %87 = vector.load %arg5[%c1, %c0_30, %c0_31] : memref<2x4x256xf32, #tpu.memory_space<vmem>>, vector<1x4x256xf32>
    %88 = vector.shape_cast %87 : vector<1x4x256xf32> to vector<4x256xf32>
    %c1_32 = arith.constant 1 : index
    %c0_33 = arith.constant 0 : index
    %c0_34 = arith.constant 0 : index
    %89 = vector.load %arg6[%c1_32, %c0_33, %c0_34] : memref<2x6x256xf32, #tpu.memory_space<vmem>>, vector<1x6x256xf32>
    %90 = vector.shape_cast %89 : vector<1x6x256xf32> to vector<6x256xf32>
    %cst_35 = arith.constant dense<0.000000e+00> : vector<9x256xf32>
    %91 = tpu.matmul %1, %88, %cst_35 {dimension_numbers = #tpu.dot_dimension_numbers<[1], [0], [0], [1], [0, 0, 1, 1], [], []>, precision = #tpu.contract_precision<fp32>} : vector<9x4xf32>, vector<4x256xf32>, vector<9x256xf32> -> vector<9x256xf32>
    %92 = arith.mulf %91, %0 : vector<9x256xf32>
    %93 = vector.extract_strided_slice %92 {offsets = [0, 0], sizes = [1, 256], strides = [1, 1]} : vector<9x256xf32> to vector<1x256xf32>
    %c17_i32_36 = arith.constant 17 : i32
    %94 = tpu.dynamic_rotate %93 by %c17_i32_36 dim 1 : vector<1x256xf32>, i32 -> vector<1x256xf32>
    %95 = vector.extract_strided_slice %92 {offsets = [1, 0], sizes = [1, 256], strides = [1, 1]} : vector<9x256xf32> to vector<1x256xf32>
    %c16_i32_37 = arith.constant 16 : i32
    %96 = tpu.dynamic_rotate %95 by %c16_i32_37 dim 1 : vector<1x256xf32>, i32 -> vector<1x256xf32>
    %97 = vector.extract_strided_slice %92 {offsets = [2, 0], sizes = [1, 256], strides = [1, 1]} : vector<9x256xf32> to vector<1x256xf32>
    %c15_i32_38 = arith.constant 15 : i32
    %98 = tpu.dynamic_rotate %97 by %c15_i32_38 dim 1 : vector<1x256xf32>, i32 -> vector<1x256xf32>
    %99 = vector.extract_strided_slice %92 {offsets = [3, 0], sizes = [1, 256], strides = [1, 1]} : vector<9x256xf32> to vector<1x256xf32>
    %c1_i32_39 = arith.constant 1 : i32
    %100 = tpu.dynamic_rotate %99 by %c1_i32_39 dim 1 : vector<1x256xf32>, i32 -> vector<1x256xf32>
    %101 = vector.extract_strided_slice %92 {offsets = [4, 0], sizes = [1, 256], strides = [1, 1]} : vector<9x256xf32> to vector<1x256xf32>
    %102 = vector.extract_strided_slice %92 {offsets = [5, 0], sizes = [1, 256], strides = [1, 1]} : vector<9x256xf32> to vector<1x256xf32>
    %c255_i32_40 = arith.constant 255 : i32
    %103 = tpu.dynamic_rotate %102 by %c255_i32_40 dim 1 : vector<1x256xf32>, i32 -> vector<1x256xf32>
    %104 = vector.extract_strided_slice %92 {offsets = [6, 0], sizes = [1, 256], strides = [1, 1]} : vector<9x256xf32> to vector<1x256xf32>
    %c241_i32_41 = arith.constant 241 : i32
    %105 = tpu.dynamic_rotate %104 by %c241_i32_41 dim 1 : vector<1x256xf32>, i32 -> vector<1x256xf32>
    %106 = vector.extract_strided_slice %92 {offsets = [7, 0], sizes = [1, 256], strides = [1, 1]} : vector<9x256xf32> to vector<1x256xf32>
    %c240_i32_42 = arith.constant 240 : i32
    %107 = tpu.dynamic_rotate %106 by %c240_i32_42 dim 1 : vector<1x256xf32>, i32 -> vector<1x256xf32>
    %108 = vector.extract_strided_slice %92 {offsets = [8, 0], sizes = [1, 256], strides = [1, 1]} : vector<9x256xf32> to vector<1x256xf32>
    %c239_i32_43 = arith.constant 239 : i32
    %109 = tpu.dynamic_rotate %108 by %c239_i32_43 dim 1 : vector<1x256xf32>, i32 -> vector<1x256xf32>
    %110 = arith.addf %94, %96 : vector<1x256xf32>
    %111 = arith.addf %98, %100 : vector<1x256xf32>
    %112 = arith.addf %101, %103 : vector<1x256xf32>
    %113 = arith.addf %105, %107 : vector<1x256xf32>
    %114 = arith.addf %110, %111 : vector<1x256xf32>
    %115 = arith.addf %112, %113 : vector<1x256xf32>
    %116 = arith.addf %114, %115 : vector<1x256xf32>
    %117 = arith.addf %116, %109 : vector<1x256xf32>
    %118 = vector.broadcast %3 : f32 to vector<1x256xf32>
    %119 = arith.addf %117, %118 : vector<1x256xf32>
    %cst_44 = arith.constant dense<0.000000e+00> : vector<9x256xf32>
    %120 = tpu.matmul %2, %90, %cst_44 {dimension_numbers = #tpu.dot_dimension_numbers<[1], [0], [0], [1], [0, 0, 1, 1], [], []>, precision = #tpu.contract_precision<fp32>} : vector<9x6xf32>, vector<6x256xf32>, vector<9x256xf32> -> vector<9x256xf32>
    %121 = arith.mulf %120, %0 : vector<9x256xf32>
    %122 = vector.extract_strided_slice %121 {offsets = [0, 0], sizes = [1, 256], strides = [1, 1]} : vector<9x256xf32> to vector<1x256xf32>
    %c17_i32_45 = arith.constant 17 : i32
    %123 = tpu.dynamic_rotate %122 by %c17_i32_45 dim 1 : vector<1x256xf32>, i32 -> vector<1x256xf32>
    %124 = vector.extract_strided_slice %121 {offsets = [1, 0], sizes = [1, 256], strides = [1, 1]} : vector<9x256xf32> to vector<1x256xf32>
    %c16_i32_46 = arith.constant 16 : i32
    %125 = tpu.dynamic_rotate %124 by %c16_i32_46 dim 1 : vector<1x256xf32>, i32 -> vector<1x256xf32>
    %126 = vector.extract_strided_slice %121 {offsets = [2, 0], sizes = [1, 256], strides = [1, 1]} : vector<9x256xf32> to vector<1x256xf32>
    %c15_i32_47 = arith.constant 15 : i32
    %127 = tpu.dynamic_rotate %126 by %c15_i32_47 dim 1 : vector<1x256xf32>, i32 -> vector<1x256xf32>
    %128 = vector.extract_strided_slice %121 {offsets = [3, 0], sizes = [1, 256], strides = [1, 1]} : vector<9x256xf32> to vector<1x256xf32>
    %c1_i32_48 = arith.constant 1 : i32
    %129 = tpu.dynamic_rotate %128 by %c1_i32_48 dim 1 : vector<1x256xf32>, i32 -> vector<1x256xf32>
    %130 = vector.extract_strided_slice %121 {offsets = [4, 0], sizes = [1, 256], strides = [1, 1]} : vector<9x256xf32> to vector<1x256xf32>
    %131 = vector.extract_strided_slice %121 {offsets = [5, 0], sizes = [1, 256], strides = [1, 1]} : vector<9x256xf32> to vector<1x256xf32>
    %c255_i32_49 = arith.constant 255 : i32
    %132 = tpu.dynamic_rotate %131 by %c255_i32_49 dim 1 : vector<1x256xf32>, i32 -> vector<1x256xf32>
    %133 = vector.extract_strided_slice %121 {offsets = [6, 0], sizes = [1, 256], strides = [1, 1]} : vector<9x256xf32> to vector<1x256xf32>
    %c241_i32_50 = arith.constant 241 : i32
    %134 = tpu.dynamic_rotate %133 by %c241_i32_50 dim 1 : vector<1x256xf32>, i32 -> vector<1x256xf32>
    %135 = vector.extract_strided_slice %121 {offsets = [7, 0], sizes = [1, 256], strides = [1, 1]} : vector<9x256xf32> to vector<1x256xf32>
    %c240_i32_51 = arith.constant 240 : i32
    %136 = tpu.dynamic_rotate %135 by %c240_i32_51 dim 1 : vector<1x256xf32>, i32 -> vector<1x256xf32>
    %137 = vector.extract_strided_slice %121 {offsets = [8, 0], sizes = [1, 256], strides = [1, 1]} : vector<9x256xf32> to vector<1x256xf32>
    %c239_i32_52 = arith.constant 239 : i32
    %138 = tpu.dynamic_rotate %137 by %c239_i32_52 dim 1 : vector<1x256xf32>, i32 -> vector<1x256xf32>
    %139 = arith.addf %123, %125 : vector<1x256xf32>
    %140 = arith.addf %127, %129 : vector<1x256xf32>
    %141 = arith.addf %130, %132 : vector<1x256xf32>
    %142 = arith.addf %134, %136 : vector<1x256xf32>
    %143 = arith.addf %139, %140 : vector<1x256xf32>
    %144 = arith.addf %141, %142 : vector<1x256xf32>
    %145 = arith.addf %143, %144 : vector<1x256xf32>
    %146 = arith.addf %145, %138 : vector<1x256xf32>
    %147 = vector.broadcast %4 : f32 to vector<1x256xf32>
    %148 = arith.addf %146, %147 : vector<1x256xf32>
    %149 = arith.negf %119 : vector<1x256xf32>
    %150 = math.exp %149 : vector<1x256xf32>
    %cst_53 = arith.constant 1.000000e+00 : f32
    %151 = vector.broadcast %cst_53 : f32 to vector<1x256xf32>
    %152 = arith.addf %151, %150 : vector<1x256xf32>
    %153 = arith.divf %151, %152 : vector<1x256xf32>
    %154 = arith.negf %148 : vector<1x256xf32>
    %155 = math.exp %154 : vector<1x256xf32>
    %cst_54 = arith.constant 1.000000e+00 : f32
    %156 = vector.broadcast %cst_54 : f32 to vector<1x256xf32>
    %157 = arith.addf %156, %155 : vector<1x256xf32>
    %158 = arith.divf %156, %157 : vector<1x256xf32>
    %159 = vector.broadcast %158 : vector<1x256xf32> to vector<4x256xf32>
    %160 = arith.mulf %88, %159 : vector<4x256xf32>
    %c1_55 = arith.constant 1 : index
    %c0_56 = arith.constant 0 : index
    %c0_57 = arith.constant 0 : index
    %161 = vector.load %arg7[%c1_55, %c0_56, %c0_57] : memref<2x4x256xf32, #tpu.memory_space<vmem>>, vector<1x4x256xf32>
    %162 = vector.shape_cast %161 : vector<1x4x256xf32> to vector<4x256xf32>
    %163 = vector.shape_cast %160 : vector<4x256xf32> to vector<1x4x256xf32>
    tpu.vector_store %arg7[%c1_55, %c0_56, %c0_57], %163 {strides = array<i32>} : memref<2x4x256xf32, #tpu.memory_space<vmem>>, vector<1x4x256xf32>,
    %164 = vector.broadcast %153 : vector<1x256xf32> to vector<6x256xf32>
    %165 = arith.mulf %90, %164 : vector<6x256xf32>
    %c1_58 = arith.constant 1 : index
    %c0_59 = arith.constant 0 : index
    %c0_60 = arith.constant 0 : index
    %166 = vector.load %arg8[%c1_58, %c0_59, %c0_60] : memref<2x6x256xf32, #tpu.memory_space<vmem>>, vector<1x6x256xf32>
    %167 = vector.shape_cast %166 : vector<1x6x256xf32> to vector<6x256xf32>
    %168 = vector.shape_cast %165 : vector<6x256xf32> to vector<1x6x256xf32>
    tpu.vector_store %arg8[%c1_58, %c0_59, %c0_60], %168 {strides = array<i32>} : memref<2x6x256xf32, #tpu.memory_space<vmem>>, vector<1x6x256xf32>,
    return
  }
}

</mosaic_0001>

<bundles_post_ra>
// kernel: tpu_custom_call.1
= control target key start
LH: loop header
LB: loop body
LE: loop exit
PB: predicated region body
PF: predicated region fallthrough
CT: control target
= control target key end

     0   :  { %vm53_vm0 = vcmask 1043456   ;;  %vm704_vm1 = vcmask 1045504   ;;  %v2904_v5 = vmov 0.0   ;;  %vm46_vm2 = vcmask 31744   ;;  %s3702_s0 = inlined_call_operand.vmem [shape: f32[9,256], index: 0, kind: input, shape index: {}]   ;;  %s3703_s1 = inlined_call_operand.vmem [shape: f32[9,4], index: 1, kind: input, shape index: {}]   ;;  %s3704_s2 = inlined_call_operand.vmem [shape: f32[9,6], index: 2, kind: input, shape index: {}]   ;;  %s3705_s3 = inlined_call_operand.<no memory space> [shape: f32[1], index: 3, kind: input, shape index: {}]   ;;  %s3706_s4 = inlined_call_operand.<no memory space> [shape: f32[1], index: 4, kind: input, shape index: {}]   ;;  %s3707_s5 = inlined_call_operand.vmem [shape: f32[2,4,256], index: 5, kind: input, shape index: {}]   ;;  %s3708_s6 = inlined_call_operand.vmem [shape: f32[2,6,256], index: 6, kind: input, shape index: {}]   ;;  %s3709_s7 = inlined_call_operand.hbm [shape: f32[2,4,256], index: 7, kind: output, shape index: {0}]   ;;  %s3710_s8 = inlined_call_operand.vmem [shape: f32[2,6,256], index: 8, kind: output, shape index: {1}]  }
   0x1   :  { %v41_v0 = vld [vmem:[%s3707_s5] sm:$0xff]  ;;  %v43_v1 = vld [vmem:[%s3708_s6 + $0x8] sm:$0x3f]  ;;  %124 = vmatprep.mubr.f32.mxu0 %v2904_v5  ;;  %777 = vmatprep.mubr.f32.mxu1 %v2904_v5  ;;  %vm697_vm3 = vcmask 48128  }
   0x2   :  { %v45_v2 = vcombine.high %v41_v0, %v41_v0  ;;  %v709_v3 = vsel %vm704_vm1, %v43_v1, 0  ;;  %v54_v4 = vsel %vm53_vm0, %v41_v0, 0  ;;  %v42_v6 = vld [vmem:[%s3708_s6] sm:$0x3f]  ;;  %v36_v16 = vld [vmem:[%s3703_s1 + $0x8] sm:$0x1] }
   0x3   :  { %v35_v7 = vld [vmem:[%s3703_s1] sm:$0xff]  ;;  %v2977_v8 = vand.u32 4294901760, %v709_v3  ;;  %v2979_v9 = vand.u32 4294901760, %v54_v4  ;;  %v706_v10 = vsel %vm704_vm1, %v42_v6, 0  ;;  %v38_v21 = vld [vmem:[%s3704_s2 + $0x8] sm:$0x1] }
   0x4   :  { %v48_v11 = vsel %vm46_vm2, %v35_v7, 0  ;;  %v37_v12 = vld [vmem:[%s3704_s2] sm:$0xff]  ;;  %v56_v13 = vsel %vm53_vm0, %v45_v2, 0  ;;  %v2987_v14 = vand.u32 4294901760, %v706_v10  ;;  %v51_v25 = vsel %vm46_vm2, %v36_v16, 0 }
   0x5   :  { %v2989_v15 = vand.u32 4294901760, %v48_v11  ;;  %v2994_v17 = vand.u32 4294901760, %v56_v13  ;;  %712 = vmatprep.subr.mxu1 %v2977_v8  ;;  %v2998_v18 = vsub.f32 %v54_v4, %v2979_v9  ;;  %v699_v19 = vsel %vm697_vm3, %v37_v12, 0 }
   0x6   :  { %v3002_v20 = vsub.f32 %v709_v3, %v2977_v8  ;;  %714 = vmatpush1.msra.mxu1 %v2987_v14  ;;  %v3009_v22 = vsub.f32 %v706_v10, %v2987_v14  ;;  %v3014_v24 = vand.u32 4294901760, %v699_v19  ;;  %v3023_v29 = vand.u32 4294901760, %v51_v25 }
   0x7   :  { %v3012_v23 = vsub.f32 %v48_v11, %v2989_v15  ;;  %59 = vmatprep.subr.mxu0 %v2994_v17  ;;  %v3020_v27 = vsub.f32 %v56_v13, %v2994_v17  ;;  %v155_v28 = vand.u32 4294901760, %v2998_v18 }
   0x8   :  { %v802_v26 = vand.u32 4294901760, %v3002_v20 }
   0x9   :  { %16 = vsyncpa [#allocation5], 0  ;;  %61 = vmatpush1.msra.mxu0 %v2979_v9  ;;  %v3027_v30 = vand.u32 4294901760, %v3012_v23  ;;  %v3030_v31 = vsub.f32 %v699_v19, %v3014_v24  ;;  %v808_v32 = vand.u32 4294901760, %v3009_v22  ;;  %v702_v33 = vsel %vm697_vm3, %v38_v21, 0  ;;  %v2739_v57 = vld [vmem:[%s3707_s5 + $0x8] sm:$0xff] }
   0xa   :  { %v803_v34 = vsub.f32 %v3002_v20, %v802_v26  ;;  %v149_v35 = vand.u32 4294901760, %v3020_v27  ;;  %v156_v36 = vsub.f32 %v2998_v18, %v155_v28  ;;  %v3042_v37 = vsub.f32 %v51_v25, %v3023_v29  ;;  %v2741_v59 = vld [vmem:[%s3708_s6 + $0x18] sm:$0x3f]  ;;  %v2740_v0 = vld [vmem:[%s3708_s6 + $0x10] sm:$0x3f]  ;;  %s2905_s27 = smov 17  }
   0xb   :  { %v128_v38 = vsub.f32 %v3012_v23, %v3027_v30  ;;  %v3047_v39 = vand.u32 4294901760, %v3030_v31  ;;  %v809_v40 = vsub.f32 %v3009_v22, %v808_v32  ;;  %v3052_v41 = vand.u32 4294901760, %v702_v33  ;;  %s2906_s28 = smov 16   ;;  %s2907_s29 = smov 127  }
   0xc   :  { %v804_v42 = vand.u32 4294901760, %v803_v34  ;;  %v150_v43 = vsub.f32 %v3020_v27, %v149_v35  ;;  %v3056_v44 = vand.u32 4294901760, %v3042_v37  ;;  %v157_v47 = vand.u32 4294901760, %v156_v36  ;;  %s2908_s30 = smov 15   ;;  %s2909_s9 = smov 113  }
   0xd   :  { %v3058_v45 = vand.u32 4294901760, %v128_v38  ;;  %v781_v46 = vsub.f32 %v3030_v31, %v3047_v39  ;;  %v3063_v48 = vsub.f32 %v702_v33, %v3052_v41  ;;  %v810_v50 = vand.u32 4294901760, %v809_v40  ;;  %s2910_s10 = smov 1   ;;  %s2911_s11 = smov 112  }
   0xe   :  { %805 = vmatprep.subr.mxu1 %v804_v42  ;;  %v151_v49 = vand.u32 4294901760, %v150_v43  ;;  %v139_v51 = vsub.f32 %v3042_v37, %v3056_v44  ;;  %v1396_v58 = vcombine.high %v2739_v57, %v2739_v57  ;;  %v2033_v61 = vsel %vm704_vm1, %v2741_v59, 0  ;;  %s2912_s14 = smov 111   ;;  %s2913_s26 = smov [#allocation4]  }
   0xf   :  { %130 = vmatmul.mubr.f32.vlgmr.msra.gmra.mrb[0].mxu0 %v3058_v45  ;;  %v3068_v52 = vand.u32 4294901760, %v781_v46  ;;  %v3071_v53 = vand.u32 4294901760, %v3063_v48  ;;  %v3123_v63 = vand.u32 4294901760, %v2033_v61  ;;  %v1397_v1 = vsel %vm53_vm0, %v2739_v57, 0 }
  0x10   :  { %152 = vmatprep.subr.mxu0 %v151_v49  ;;  %135 = vmatprep.mubr.f32.mxu0 %v2904_v5  ;;  %v3074_v54 = vand.u32 4294901760, %v139_v51  ;;  %v1399_v60 = vsel %vm53_vm0, %v1396_v58, 0  ;;  %v2030_v3 = vsel %vm704_vm1, %v2740_v0, 0  ;;  %v3147_v6 = vand.u32 4294901760, %v1397_v1 }
  0x11   :  { %783 = vmatmul.mubr.f32.vlgmr.msra.gmra.mrb[0].mxu1 %v3068_v52  ;;  %158 = vmatpush1.msra.mxu0 %v157_v47  ;;  %v792_v55 = vsub.f32 %v3063_v48, %v3071_v53  ;;  %v3119_v62 = vand.u32 4294901760, %v1399_v60  ;;  %v3144_v4 = vsub.f32 %v2033_v61, %v3123_v63  ;;  %v3152_v10 = vand.u32 4294901760, %v2030_v3 }
  0x12   :  { %811 = vmatpush1.msra.mxu1 %v810_v50  ;;  %788 = vmatprep.mubr.f32.mxu1 %v2904_v5  ;;  %v3159_v11 = vsub.f32 %v1397_v1, %v3147_v6 }
  0x13   :  { %141 = vmatmul.mubr.f32.gmra.mrb[2].mxu0 %v3074_v54  ;;  %v3081_v56 = vand.u32 4294901760, %v792_v55  ;;  %891 = vmatprep.subr.mxu1 %v3002_v20  ;;  %v3135_v2 = vsub.f32 %v1399_v60, %v3119_v62  ;;  %v3169_v13 = vsub.f32 %v2030_v3, %v3152_v10 }
  0x14   :  { %221 = vmatprep.mubr.f32.mxu0 %v2904_v5  ;;  %238 = vmatprep.subr.mxu0 %v3020_v27  ;;  %v1498_v16 = vand.u32 4294901760, %v3159_v11 }
  0x15   :  { %794 = vmatmul.mubr.f32.gmra.mrb[2].mxu1 %v3081_v56  ;;  %v1492_v7 = vand.u32 4294901760, %v3135_v2 }
  0x16   :  { %874 = vmatprep.mubr.f32.mxu1 %v2904_v5  ;;  %v1499_v19 = vsub.f32 %v3159_v11, %v1498_v16 }
  0x17   :  { %223 = vmatmul.mubr.f32.vlgmr.msra.gmra.mrb[0].mxu0 %v2989_v15  ;;  %v1493_v12 = vsub.f32 %v3135_v2, %v1492_v7 }
  0x18   :  { %228 = vmatprep.mubr.f32.mxu0 %v2904_v5  ;;  %241 = vmatpush1.msra.mxu0 %v2998_v18  ;;  %v1500_v21 = vand.u32 4294901760, %v1499_v19 }
  0x19   :  { %876 = vmatmul.mubr.f32.vlgmr.msra.gmra.mrb[0].mxu1 %v3014_v24  ;;  %322 = vmatprep.subr.mxu0 %v2994_v17 }
  0x1a   :  { %894 = vmatpush1.msra.mxu1 %v3009_v22  ;;  %881 = vmatprep.mubr.f32.mxu1 %v2904_v5 }
  0x1b   :  { %230 = vmatmul.mubr.f32.gmra.mrb[2].mxu0 %v3023_v29  ;;  %975 = vmatprep.subr.mxu1 %v2977_v8 }
  0x1c   :  { %304 = vmatprep.mubr.f32.mxu0 %v2904_v5 }
  0x1d   :  { %883 = vmatmul.mubr.f32.gmra.mrb[2].mxu1 %v3052_v41 }
  0x1e   :  { %957 = vmatprep.mubr.f32.mxu1 %v2904_v5 }
  0x1f   :  { %307 = vmatmul.mubr.f32.vlgmr.msra.gmra.mrb[0].mxu0 %v3012_v23 }
  0x20   :  { %312 = vmatprep.mubr.f32.mxu0 %v2904_v5  ;;  %324 = vmatpush1.msra.mxu0 %v2979_v9 }
  0x21   :  { %960 = vmatmul.mubr.f32.vlgmr.msra.gmra.mrb[0].mxu1 %v3030_v31  ;;  %409 = vmatprep.subr.mxu0 %v149_v35 }
  0x22   :  { %977 = vmatpush1.msra.mxu1 %v2987_v14  ;;  %965 = vmatprep.mubr.f32.mxu1 %v2904_v5 }
  0x23   :  { %315 = vmatmul.mubr.f32.gmra.mrb[2].mxu0 %v3042_v37  ;;  %1062 = vmatprep.subr.mxu1 %v802_v26 }
  0x24   :  { %387 = vmatprep.mubr.f32.mxu0 %v2904_v5 }
  0x25   :  { %968 = vmatmul.mubr.f32.gmra.mrb[2].mxu1 %v3063_v48 }
  0x26   :  { %1040 = vmatprep.mubr.f32.mxu1 %v2904_v5 }
  0x27   :  { %391 = vmatmul.mubr.f32.vlgmr.msra.gmra.mrb[0].mxu0 %v3027_v30 }
  0x28   :  { %396 = vmatprep.mubr.f32.mxu0 %v2904_v5  ;;  %413 = vmatpush1.msra.mxu0 %v155_v28 }
  0x29   :  { %1044 = vmatmul.mubr.f32.vlgmr.msra.gmra.mrb[0].mxu1 %v3047_v39  ;;  %492 = vmatprep.subr.mxu0 %v2994_v17  ;;  %v2132_v17 = vand.u32 4294901760, %v3169_v13 }
  0x2a   :  { %1066 = vmatpush1.msra.mxu1 %v808_v32  ;;  %1049 = vmatprep.mubr.f32.mxu1 %v2904_v5 }
  0x2b   :  { %400 = vmatmul.mubr.f32.gmra.mrb[2].mxu0 %v3056_v44  ;;  %1145 = vmatprep.subr.mxu1 %v2977_v8  ;;  %v2126_v8 = vand.u32 4294901760, %v3144_v4  ;;  %v2133_v20 = vsub.f32 %v3169_v13, %v2132_v17 }
  0x2c   :  { %476 = vmatprep.mubr.f32.mxu0 %v2904_v5 }
  0x2d   :  { %1053 = vmatmul.mubr.f32.gmra.mrb[2].mxu1 %v3071_v53  ;;  %v2134_v22 = vand.u32 4294901760, %v2133_v20 }
  0x2e   :  { %1129 = vmatprep.mubr.f32.mxu1 %v2904_v5 }
  0x2f   :  { %478 = vmatmul.mubr.f32.vlgmr.msra.gmra.mrb[0].mxu0 %v2989_v15 }
  0x30   :  { %483 = vmatprep.mubr.f32.mxu0 %v2904_v5  ;;  %494 = vmatpush1.msra.mxu0 %v2979_v9  ;;  %v2127_v9 = vsub.f32 %v3144_v4, %v2126_v8 }
  0x31   :  { %1131 = vmatmul.mubr.f32.vlgmr.msra.gmra.mrb[0].mxu1 %v3014_v24  ;;  %1402 = vmatprep.subr.mxu0 %v3119_v62 }
  0x32   :  { %1147 = vmatpush1.msra.mxu1 %v2987_v14  ;;  %1136 = vmatprep.mubr.f32.mxu1 %v2904_v5  ;;  %v1494_v14 = vand.u32 4294901760, %v1493_v12  ;;  %v2128_v18 = vand.u32 4294901760, %v2127_v9 }
  0x33   :  { %485 = vmatmul.mubr.f32.gmra.mrb[2].mxu0 %v3023_v29  ;;  %2036 = vmatprep.subr.mxu1 %v3123_v63 }
  0x34   :  { %557 = vmatprep.mubr.f32.mxu0 %v2904_v5 }
  0x35   :  { %1138 = vmatmul.mubr.f32.gmra.mrb[2].mxu1 %v3052_v41 }
  0x36   :  { %1210 = vmatprep.mubr.f32.mxu1 %v2904_v5 }
  0x37   :  { %559 = vmatmul.mubr.f32.vlgmr.msra.gmra.mrb[0].mxu0 %v2989_v15 }
  0x38   :  { %564 = vmatprep.mubr.f32.mxu0 %v2904_v5  ;;  %1404 = vmatpush1.msra.mxu0 %v3147_v6 }
  0x39   :  { %1212 = vmatmul.mubr.f32.vlgmr.msra.gmra.mrb[0].mxu1 %v3014_v24  ;;  %1495 = vmatprep.subr.mxu0 %v1494_v14 }
  0x3a   :  { %1217 = vmatprep.mubr.f32.mxu1 %v2904_v5  ;;  %2038 = vmatpush1.msra.mxu1 %v3152_v10 }
  0x3b   :  { %566 = vmatmul.mubr.f32.gmra.mrb[2].mxu0 %v3023_v29  ;;  %2129 = vmatprep.subr.mxu1 %v2128_v18 }
  0x3c   :  { %1467 = vmatprep.mubr.f32.mxu0 %v2904_v5 }
  0x3d   :  { %1219 = vmatmul.mubr.f32.gmra.mrb[2].mxu1 %v3052_v41 }
  0x3e   :  { %2101 = vmatprep.mubr.f32.mxu1 %v2904_v5 }
  0x3f   :  { %1473 = vmatmul.mubr.f32.vlgmr.msra.gmra.mrb[4].mxu0 %v3058_v45 }
  0x40   :  { %1478 = vmatprep.mubr.f32.mxu0 %v2904_v5  ;;  %1501 = vmatpush1.msra.mxu0 %v1500_v21 }
  0x41   :  { %2107 = vmatmul.mubr.f32.vlgmr.msra.gmra.mrb[4].mxu1 %v3068_v52  ;;  %1581 = vmatprep.subr.mxu0 %v3135_v2 }
  0x42   :  { %2112 = vmatprep.mubr.f32.mxu1 %v2904_v5  ;;  %2135 = vmatpush1.msra.mxu1 %v2134_v22 }
  0x43   :  { %1484 = vmatmul.mubr.f32.gmra.mrb[6].mxu0 %v3074_v54  ;;  %2215 = vmatprep.subr.mxu1 %v3144_v4 }
  0x44   :  { %1564 = vmatprep.mubr.f32.mxu0 %v2904_v5 }
  0x45   :  { %2118 = vmatmul.mubr.f32.gmra.mrb[6].mxu1 %v3081_v56 }
  0x46   :  { %2198 = vmatprep.mubr.f32.mxu1 %v2904_v5 }
  0x47   :  { %1566 = vmatmul.mubr.f32.vlgmr.msra.gmra.mrb[4].mxu0 %v2989_v15 }
  0x48   :  { %1571 = vmatprep.mubr.f32.mxu0 %v2904_v5  ;;  %1584 = vmatpush1.msra.mxu0 %v3159_v11 }
  0x49   :  { %2200 = vmatmul.mubr.f32.vlgmr.msra.gmra.mrb[4].mxu1 %v3014_v24  ;;  %1665 = vmatprep.subr.mxu0 %v3119_v62 }
  0x4a   :  { %2205 = vmatprep.mubr.f32.mxu1 %v2904_v5  ;;  %2218 = vmatpush1.msra.mxu1 %v3169_v13 }
  0x4b   :  { %1573 = vmatmul.mubr.f32.gmra.mrb[6].mxu0 %v3023_v29  ;;  %2299 = vmatprep.subr.mxu1 %v3123_v63 }
  0x4c   :  { %1647 = vmatprep.mubr.f32.mxu0 %v2904_v5 }
  0x4d   :  { %2207 = vmatmul.mubr.f32.gmra.mrb[6].mxu1 %v3052_v41 }
  0x4e   :  { %2281 = vmatprep.mubr.f32.mxu1 %v2904_v5 }
  0x4f   :  { %1650 = vmatmul.mubr.f32.vlgmr.msra.gmra.mrb[4].mxu0 %v3012_v23  ;;  %v3258_v23 = vld [vmem:[%s3702_s0] sm:$0xff] }
  0x50   :  { %1655 = vmatprep.mubr.f32.mxu0 %v2904_v5  ;;  %1667 = vmatpush1.msra.mxu0 %v3147_v6 }
  0x51   :  { %2284 = vmatmul.mubr.f32.vlgmr.msra.gmra.mrb[4].mxu1 %v3030_v31  ;;  %1752 = vmatprep.subr.mxu0 %v1492_v7 }
  0x52   :  { %2289 = vmatprep.mubr.f32.mxu1 %v2904_v5  ;;  %2301 = vmatpush1.msra.mxu1 %v3152_v10 }
  0x53   :  { %1658 = vmatmul.mubr.f32.gmra.mrb[6].mxu0 %v3042_v37  ;;  %2386 = vmatprep.subr.mxu1 %v2126_v8 }
  0x54   :  { %1730 = vmatprep.mubr.f32.mxu0 %v2904_v5 }
  0x55   :  { %2292 = vmatmul.mubr.f32.gmra.mrb[6].mxu1 %v3063_v48 }
  0x56   :  { %2364 = vmatprep.mubr.f32.mxu1 %v2904_v5 }
  0x57   :  { %1734 = vmatmul.mubr.f32.vlgmr.msra.gmra.mrb[4].mxu0 %v3027_v30 }
  0x58   :  { %1739 = vmatprep.mubr.f32.mxu0 %v2904_v5  ;;  %1756 = vmatpush1.msra.mxu0 %v1498_v16  ;;  %v3383_v16 = vld [vmem:[%s3702_s0 + $0x18] sm:$0x1] }
  0x59   :  { %2368 = vmatmul.mubr.f32.vlgmr.msra.gmra.mrb[4].mxu1 %v3047_v39  ;;  %1835 = vmatprep.subr.mxu0 %v3119_v62 }
  0x5a   :  { %2373 = vmatprep.mubr.f32.mxu1 %v2904_v5  ;;  %2390 = vmatpush1.msra.mxu1 %v2132_v17 }
  0x5b   :  { %1743 = vmatmul.mubr.f32.gmra.mrb[6].mxu0 %v3056_v44  ;;  %2469 = vmatprep.subr.mxu1 %v3123_v63 }
  0x5c   :  { %1819 = vmatprep.mubr.f32.mxu0 %v2904_v5 }
  0x5d   :  { %2377 = vmatmul.mubr.f32.gmra.mrb[6].mxu1 %v3071_v53 }
  0x5e   :  { %2453 = vmatprep.mubr.f32.mxu1 %v2904_v5 }
  0x5f   :  { %1821 = vmatmul.mubr.f32.vlgmr.msra.gmra.mrb[4].mxu0 %v2989_v15 }
  0x60   :  { %1826 = vmatprep.mubr.f32.mxu0 %v2904_v5  ;;  %1837 = vmatpush1.msra.mxu0 %v3147_v6 }
  0x61   :  { %2455 = vmatmul.mubr.f32.vlgmr.msra.gmra.mrb[4].mxu1 %v3014_v24 }
  0x62   :  { %2460 = vmatprep.mubr.f32.mxu1 %v2904_v5  ;;  %2471 = vmatpush1.msra.mxu1 %v3152_v10 }
  0x63   :  { %1828 = vmatmul.mubr.f32.gmra.mrb[6].mxu0 %v3023_v29 }
  0x64   :  { %1900 = vmatprep.mubr.f32.mxu0 %v2904_v5 }
  0x65   :  { %2462 = vmatmul.mubr.f32.gmra.mrb[6].mxu1 %v3052_v41 }
  0x66   :  { %2534 = vmatprep.mubr.f32.mxu1 %v2904_v5 }
  0x67   :  { %1902 = vmatmul.mubr.f32.vlgmr.msra.gmra.mrb[4].mxu0 %v2989_v15  ;;  %v3266_v15 = vld [vmem:[%s3702_s0 + $0x8] sm:$0xff] }
  0x68   :  { %1907 = vmatprep.mubr.f32.mxu0 %v2904_v5 }
  0x69   :  { %2536 = vmatmul.mubr.f32.vlgmr.msra.gmra.mrb[4].mxu1 %v3014_v24 }
  0x6a   :  { %2541 = vmatprep.mubr.f32.mxu1 %v2904_v5 }
  0x6b   :  { %1909 = vmatmul.mubr.f32.gmra.mrb[6].mxu0 %v3023_v29 }
  0x6d   :  { %2543 = vmatmul.mubr.f32.gmra.mrb[6].mxu1 %v3052_v41 }
 0x10a   :  { %v560_v25 = vpop.f32.mrb[0].mxu0 }
 0x10b   :  { %v3261_v26 = vmul.f32 %v560_v25, %v3258_v23  ;;  %v562_v24 = vpop.f32.mrb[1].mxu0 }
 0x10c   :  { %v1213_v5 = vpop.f32.mrb[0].mxu1  ;;  %v3290_v35 = vmul.f32 %v562_v24, %v3266_v15 }
 0x10d   :  { %v1215_v27 = vpop.f32.mrb[1].mxu1  ;;  %576 = vrot.lane.b32.xlu0 %v3261_v26, %s2905_s27  ;;  %v3276_v30 = vmul.f32 %v1213_v5, %v3258_v23  ;;  %v587_v34 = vrot.slane %v3261_v26, 1  ;;  %v598_v37 = vrot.slane %v3261_v26, 2  ;;  %v609_v39 = vrot.slane %v3261_v26, 3 }
 0x10e   :  { %v3271_v28 = vmul.f32 %v1215_v27, %v3266_v15  ;;  %v3273_v29 = vpop.f32.mrb[2].mxu0  ;;  %v620_v41 = vrot.slane %v3261_v26, 5  ;;  %v588_v42 = vrot.slane %v3290_v35, 1  ;;  %v631_v43 = vrot.slane %v3261_v26, 6 }
 0x10f   :  { %v3278_v31 = vpop.f32.mrb[3].mxu0  ;;  %v1267_v36 = vrot.slane %v3276_v30, 5  ;;  %v1277_v38 = vrot.slane %v3276_v30, 6  ;;  %v1287_v40 = vrot.slane %v3276_v30, 7  ;;  %v599_v44 = vrot.slane %v3290_v35, 2 }
 0x110   :  { %v3280_v32 = vpop.f32.mrb[2].mxu1  ;;  %1231 = vrot.lane.b32.xlu1 %v3271_v28, %s2905_s27  ;;  %v642_v45 = vrot.slane %v3261_v26, 7  ;;  %v610_v46 = vrot.slane %v3290_v35, 3  ;;  %v1237_v47 = vrot.slane %v3276_v30, 1  ;;  %v621_v48 = vrot.slane %v3290_v35, 5 }
 0x111   :  { %v3284_v33 = vpop.f32.mrb[3].mxu1  ;;  %1229 = vrot.lane.b32.xlu0 %v3276_v30, %s2905_s27  ;;  %v1247_v49 = vrot.slane %v3276_v30, 2  ;;  %v632_v50 = vrot.slane %v3290_v35, 6  ;;  %v1257_v51 = vrot.slane %v3276_v30, 3  ;;  %v643_v52 = vrot.slane %v3290_v35, 7 }
 0x112   :  { %v1268_v53 = vrot.slane %v3271_v28, 5  ;;  %v1238_v55 = vrot.slane %v3271_v28, 1  ;;  %v1278_v57 = vrot.slane %v3271_v28, 6  ;;  %v1248_v61 = vrot.slane %v3271_v28, 2 }
 0x113   :  { %v1288_v63 = vrot.slane %v3271_v28, 7  ;;  %v1258_v2 = vrot.slane %v3271_v28, 3  ;;  %v1228_v17 = vmul.f32 %v3284_v33, %v3383_v16  ;;  %v575_v19 = vmul.f32 %v3278_v31, %v3383_v16 }
 0x114   :  { %591 = vrot.lane.b32.xlu1 %v587_v34, %s2906_s28 }
 0x115   :  { %578 = vrot.lane.b32.xlu0 %v3290_v35, %s2905_s27 }
 0x118   :  { %1271 = vrot.lane.b32.xlu1 %v1267_v36, %s2907_s29 }
 0x119   :  { %602 = vrot.lane.b32.xlu0 %v598_v37, %s2908_s30  ;;  %v33_v37 = vld [vmem:[%s3702_s0 + $0x10] sm:$0x1] }
 0x11c   :  { %1281 = vrot.lane.b32.xlu1 %v1277_v38, %s2909_s9  ;;  %v580_v38 = vlaneseq }
 0x11d   :  { %613 = vrot.lane.b32.xlu0 %v609_v39, %s2910_s10 }
 0x120   :  { %1291 = vrot.lane.b32.xlu1 %v1287_v40, %s2911_s11  ;;  %v1227_v40 = vmul.f32 %v3280_v32, %v33_v37 }
 0x121   :  { %624 = vrot.lane.b32.xlu0 %v620_v41, %s2907_s29  ;;  %v3430_v41 = vand.u32 127, %v580_v38 }
 0x123   :  { %vm582_vm4 = vcmp.lt.s32.totalorder %v3430_v41, 17  ;;  %vm595_vm5 = vcmp.lt.s32.totalorder %v3430_v41, 16  ;;  %vm606_vm6 = vcmp.lt.s32.totalorder %v3430_v41, 15  ;;  %vm617_vm7 = vcmp.lt.s32.totalorder %v3430_v41, 1 }
 0x124   :  { %593 = vrot.lane.b32.xlu1 %v588_v42, %s2906_s28  ;;  %vm628_vm8 = vcmp.lt.s32.totalorder %v3430_v41, 127  ;;  %vm639_vm9 = vcmp.lt.s32.totalorder %v3430_v41, 113  ;;  %vm650_vm10 = vcmp.lt.s32.totalorder %v3430_v41, 112  ;;  %vm657_vm11 = vcmp.lt.s32.totalorder %v3430_v41, 111 }
 0x125   :  { %635 = vrot.lane.b32.xlu0 %v631_v43, %s2909_s9  ;;  %v574_v43 = vmul.f32 %v3273_v29, %v33_v37 }
 0x128   :  { %604 = vrot.lane.b32.xlu1 %v599_v44, %s2908_s30 }
 0x129   :  { %646 = vrot.lane.b32.xlu0 %v642_v45, %s2911_s11 }
 0x12c   :  { %615 = vrot.lane.b32.xlu1 %v610_v46, %s2910_s10 }
 0x12d   :  { %1241 = vrot.lane.b32.xlu0 %v1237_v47, %s2906_s28 }
 0x130   :  { %626 = vrot.lane.b32.xlu1 %v621_v48, %s2907_s29 }
 0x131   :  { %1251 = vrot.lane.b32.xlu0 %v1247_v49, %s2908_s30 }
 0x134   :  { %637 = vrot.lane.b32.xlu1 %v632_v50, %s2909_s9 }
 0x135   :  { %1261 = vrot.lane.b32.xlu0 %v1257_v51, %s2910_s10 }
 0x138   :  { %648 = vrot.lane.b32.xlu1 %v643_v52, %s2911_s11 }
 0x139   :  { %1273 = vrot.lane.b32.xlu0 %v1268_v53, %s2907_s29 }
 0x13a   :  { %v1903_v54 = vpop.f32.mrb[4].mxu0 }
 0x13b   :  { %v1905_v56 = vpop.f32.mrb[5].mxu0  ;;  %v3358_v6 = vmul.f32 %v1903_v54, %v3258_v23 }
 0x13c   :  { %v2537_v58 = vpop.f32.mrb[4].mxu1  ;;  %1243 = vrot.lane.b32.xlu1 %v1238_v55, %s2906_s28  ;;  %v3365_v7 = vmul.f32 %v1905_v56, %v3266_v15 }
 0x13d   :  { %v2539_v59 = vpop.f32.mrb[5].mxu1  ;;  %1283 = vrot.lane.b32.xlu0 %v1278_v57, %s2909_s9  ;;  %v3349_v3 = vmul.f32 %v2537_v58, %v3258_v23  ;;  %v1957_v10 = vrot.slane %v3358_v6, 5  ;;  %v1967_v11 = vrot.slane %v3358_v6, 6  ;;  %v1977_v13 = vrot.slane %v3358_v6, 7 }
 0x13e   :  { %v3335_v60 = vpop.f32.mrb[6].mxu0  ;;  %v3355_v4 = vmul.f32 %v2539_v59, %v3266_v15  ;;  %v1958_v21 = vrot.slane %v3365_v7, 5  ;;  %v1927_v22 = vrot.slane %v3358_v6, 1  ;;  %v1968_v23 = vrot.slane %v3365_v7, 6 }
 0x13f   :  { %v3338_v62 = vpop.f32.mrb[7].mxu0  ;;  %v2591_v8 = vrot.slane %v3349_v3, 5  ;;  %v2601_v12 = vrot.slane %v3349_v3, 6  ;;  %v2611_v9 = vrot.slane %v3349_v3, 7  ;;  %v2561_v14 = vrot.slane %v3349_v3, 1 }
 0x140   :  { %v3341_v0 = vpop.f32.mrb[6].mxu1  ;;  %1253 = vrot.lane.b32.xlu1 %v1248_v61, %s2908_s30  ;;  %v2571_v18 = vrot.slane %v3349_v3, 2  ;;  %v2581_v20 = vrot.slane %v3349_v3, 3  ;;  %v1937_v25 = vrot.slane %v3358_v6, 2  ;;  %v1978_v15 = vrot.slane %v3365_v7, 7 }
 0x141   :  { %v3344_v1 = vpop.f32.mrb[7].mxu1  ;;  %1293 = vrot.lane.b32.xlu0 %v1288_v63, %s2911_s11  ;;  %v1947_v24 = vrot.slane %v3358_v6, 3  ;;  %v2562_v5 = vrot.slane %v3355_v4, 1  ;;  %v2592_v27 = vrot.slane %v3355_v4, 5  ;;  %v2572_v31 = vrot.slane %v3355_v4, 2 }
 0x142   :  { %v2602_v33 = vrot.slane %v3355_v4, 6  ;;  %v2582_v34 = vrot.slane %v3355_v4, 3  ;;  %v2612_v36 = vrot.slane %v3355_v4, 7  ;;  %v1928_v39 = vrot.slane %v3365_v7, 1 }
 0x143   :  { %v1938_v42 = vrot.slane %v3365_v7, 2  ;;  %v1948_v32 = vrot.slane %v3365_v7, 3  ;;  %v2551_v46 = vmul.f32 %v3341_v0, %v33_v37  ;;  %v2552_v49 = vmul.f32 %v3344_v1, %v3383_v16 }
 0x144   :  { %1263 = vrot.lane.b32.xlu1 %v1258_v2, %s2910_s10  ;;  %v1917_v51 = vmul.f32 %v3335_v60, %v33_v37  ;;  %v1918_v55 = vmul.f32 %v3338_v62, %v3383_v16 }
 0x145   :  { %2553 = vrot.lane.b32.xlu0 %v3349_v3, %s2905_s27 }
 0x148   :  { %2555 = vrot.lane.b32.xlu1 %v3355_v4, %s2905_s27 }
 0x149   :  { %1919 = vrot.lane.b32.xlu0 %v3358_v6, %s2905_s27 }
 0x14c   :  { %1921 = vrot.lane.b32.xlu1 %v3365_v7, %s2905_s27  ;;  %s2720_s27 = sshll.u32 %s2913_s26, 4  ;;  %s2721_s27 = int_to_ptr.vmem [resolvable:$true] %s2720_s27 }
 0x14d   :  { %1961 = vrot.lane.b32.xlu0 %v1957_v10, %s2907_s29  ;;  %p2885_p1 = scmp.lt.s32.totalorder %s2721_s27, %s2721_s27 }
 0x150   :  { %2595 = vrot.lane.b32.xlu1 %v2591_v8, %s2907_s29 }
 0x151   :  { %1971 = vrot.lane.b32.xlu0 %v1967_v11, %s2909_s9 }
 0x154   :  { %2605 = vrot.lane.b32.xlu1 %v2601_v12, %s2909_s9 }
 0x155   :  { %1981 = vrot.lane.b32.xlu0 %v1977_v13, %s2911_s11 }
 0x158   :  { %2615 = vrot.lane.b32.xlu1 %v2611_v9, %s2911_s11 }
 0x159   :  { %2565 = vrot.lane.b32.xlu0 %v2561_v14, %s2906_s28 }
 0x15c   :  { %1299 = vrot.lane.b32.xlu1 %v1228_v17, %s2912_s14 }
 0x15d   :  { %2575 = vrot.lane.b32.xlu0 %v2571_v18, %s2908_s30 }
 0x160   :  { %655 = vrot.lane.b32.xlu1 %v575_v19, %s2912_s14 }
 0x161   :  { %2585 = vrot.lane.b32.xlu0 %v2581_v20, %s2910_s10 }
 0x164   :  { %1963 = vrot.lane.b32.xlu1 %v1958_v21, %s2907_s29 }
 0x165   :  { %1931 = vrot.lane.b32.xlu0 %v1927_v22, %s2906_s28 }
 0x168   :  { %1973 = vrot.lane.b32.xlu1 %v1968_v23, %s2909_s9 }
 0x169   :  { %1941 = vrot.lane.b32.xlu0 %v1937_v25, %s2908_s30 }
 0x16c   :  { %1983 = vrot.lane.b32.xlu1 %v1978_v15, %s2911_s11 }
 0x16d   :  { %1951 = vrot.lane.b32.xlu0 %v1947_v24, %s2910_s10 }
 0x170   :  { %2567 = vrot.lane.b32.xlu1 %v2562_v5, %s2906_s28 }
 0x171   :  { %2597 = vrot.lane.b32.xlu0 %v2592_v27, %s2907_s29 }
 0x174   :  { %2577 = vrot.lane.b32.xlu1 %v2572_v31, %s2908_s30 }
 0x175   :  { %2607 = vrot.lane.b32.xlu0 %v2602_v33, %s2909_s9 }
 0x178   :  { %2587 = vrot.lane.b32.xlu1 %v2582_v34, %s2910_s10 }
 0x179   :  { %2617 = vrot.lane.b32.xlu0 %v2612_v36, %s2911_s11 }
 0x17c   :  { %1933 = vrot.lane.b32.xlu1 %v1928_v39, %s2906_s28 }
 0x17d   :  { %1297 = vrot.lane.b32.xlu0 %v1227_v40, %s2912_s14 }
 0x17f   :  { %v577_v44 = vpop.permute.xlu0 %576 }
 0x180   :  { %1943 = vrot.lane.b32.xlu1 %v1938_v42, %s2908_s30 }
 0x181   :  { %653 = vrot.lane.b32.xlu0 %v574_v43, %s2912_s14 }
 0x182   :  { %v1232_v45 = vpop.permute.xlu1 %1231 }
 0x183   :  { %v1230_v47 = vpop.permute.xlu0 %1229 }
 0x184   :  { %1953 = vrot.lane.b32.xlu1 %v1948_v32, %s2910_s10  ;;  %v3442_v48 = vsel %vm582_vm4, %v1230_v47, %v1232_v45  ;;  %v3446_v29 = vsel %vm582_vm4, %v1232_v45, %v1230_v47 }
 0x185   :  { %2621 = vrot.lane.b32.xlu0 %v2551_v46, %s2912_s14 }
 0x186   :  { %v592_v50 = vpop.permute.xlu1 %591 }
 0x187   :  { %v579_v52 = vpop.permute.xlu0 %578 }
 0x188   :  { %2623 = vrot.lane.b32.xlu1 %v2552_v49, %s2912_s14  ;;  %v583_v53 = vsel %vm582_vm4, %v577_v44, %v579_v52  ;;  %v584_v54 = vsel %vm582_vm4, %v579_v52, %v577_v44 }
 0x189   :  { %1987 = vrot.lane.b32.xlu0 %v1917_v51, %s2912_s14 }
 0x18a   :  { %v1272_v56 = vpop.permute.xlu1 %1271 }
 0x18b   :  { %v603_v57 = vpop.permute.xlu0 %602 }
 0x18c   :  { %1989 = vrot.lane.b32.xlu1 %v1918_v55, %s2912_s14  ;;  %s2880_s14 = scalar_lea.vmem %s2721_s27, 256 }
 0x18d   :  { %p2881_p0 = scmp.ne.s32.totalorder %s2721_s27, %s2880_s14  ;;  %p2886_p2 = scmp.lt.s32.totalorder %s2880_s14, %s2880_s14 }
 0x18e   :  { %v3461_v58 = vpop.permute.xlu1 %1281 }
 0x18f   :  { %v614_v59 = vpop.permute.xlu0 %613  ;;  %p2887_p3 = por %p2886_p2, %p2885_p1 }
 0x191   :  { %p2888_p4 = pnand %p2887_p3, %p2881_p0 }
 0x192   :  { %v3463_v60 = vpop.permute.xlu1 %1291 }
 0x193   :  { %v625_v61 = vpop.permute.xlu0 %624 }
 0x196   :  { %v594_v63 = vpop.permute.xlu1 %593 }
 0x197   :  { %v596_v0 = vsel %vm595_vm5, %v592_v50, %v594_v63  ;;  %v597_v1 = vsel %vm595_vm5, %v594_v63, %v592_v50  ;;  %v636_v62 = vpop.permute.xlu0 %635 }
 0x198   :  { %v660_v2 = vadd.f32 %v597_v1, %v584_v54  ;;  %v661_v10 = vadd.f32 %v596_v0, %v583_v53 }
 0x19a   :  { %v605_v8 = vpop.permute.xlu1 %604 }
 0x19b   :  { %v607_v11 = vsel %vm606_vm6, %v603_v57, %v605_v8  ;;  %v608_v12 = vsel %vm606_vm6, %v605_v8, %v603_v57  ;;  %v647_v13 = vpop.permute.xlu0 %646 }
 0x19e   :  { %v616_v9 = vpop.permute.xlu1 %615 }
 0x19f   :  { %v618_v16 = vsel %vm617_vm7, %v614_v59, %v616_v9  ;;  %v619_v14 = vsel %vm617_vm7, %v616_v9, %v614_v59  ;;  %v1242_v17 = vpop.permute.xlu0 %1241 }
 0x1a0   :  { %v662_v18 = vadd.f32 %v619_v14, %v608_v12  ;;  %v663_v19 = vadd.f32 %v618_v16, %v607_v11 }
 0x1a2   :  { %v674_v20 = vadd.f32 %v662_v18, %v660_v2  ;;  %v675_v21 = vadd.f32 %v663_v19, %v661_v10  ;;  %v627_v22 = vpop.permute.xlu1 %626 }
 0x1a3   :  { %v629_v23 = vsel %vm628_vm8, %v625_v61, %v627_v22  ;;  %v630_v25 = vsel %vm628_vm8, %v627_v22, %v625_v61  ;;  %v1252_v15 = vpop.permute.xlu0 %1251 }
 0x1a4   :  { %v666_v33 = vrot.slane %v629_v23, 4  ;;  %v667_v34 = vrot.slane %v630_v25, 4 }
 0x1a6   :  { %v638_v24 = vpop.permute.xlu1 %637  ;;  %v670_v44 = vadd.f32 %v666_v33, %v3261_v26  ;;  %v671_v45 = vadd.f32 %v667_v34, %v3290_v35 }
 0x1a7   :  { %v640_v5 = vsel %vm639_vm9, %v636_v62, %v638_v24  ;;  %v641_v27 = vsel %vm639_vm9, %v638_v24, %v636_v62  ;;  %v1262_v31 = vpop.permute.xlu0 %1261 }
 0x1aa   :  { %v649_v36 = vpop.permute.xlu1 %648 }
 0x1ab   :  { %v651_v37 = vsel %vm650_vm10, %v647_v13, %v649_v36  ;;  %v652_v39 = vsel %vm650_vm10, %v649_v36, %v647_v13  ;;  %v1274_v40 = vpop.permute.xlu0 %1273 }
 0x1ac   :  { %v672_v42 = vadd.f32 %v651_v37, %v640_v5  ;;  %v673_v43 = vadd.f32 %v652_v39, %v641_v27  ;;  %v1275_v49 = vsel %vm628_vm8, %v1272_v56, %v1274_v40  ;;  %v1276_v50 = vsel %vm628_vm8, %v1274_v40, %v1272_v56 }
 0x1ad   :  { %v1309_v61 = vrot.slane %v1275_v49, 4  ;;  %v1310_v63 = vrot.slane %v1276_v50, 4 }
 0x1ae   :  { %v678_v32 = vrot.slane %v672_v42, 4  ;;  %v679_v46 = vrot.slane %v673_v43, 4  ;;  %v1244_v47 = vpop.permute.xlu1 %1243 }
 0x1af   :  { %v1245_v51 = vsel %vm595_vm5, %v1242_v17, %v1244_v47  ;;  %v1246_v52 = vsel %vm595_vm5, %v1244_v47, %v1242_v17  ;;  %v1284_v53 = vpop.permute.xlu0 %1283  ;;  %v1313_v12 = vadd.f32 %v1309_v61, %v3276_v30  ;;  %v1314_v13 = vadd.f32 %v1310_v63, %v3271_v28 }
 0x1b0   :  { %v682_v54 = vadd.f32 %v678_v32, %v670_v44  ;;  %v683_v26 = vadd.f32 %v679_v46, %v671_v45  ;;  %v1303_v35 = vadd.f32 %v1246_v52, %v3446_v29  ;;  %v1304_v55 = vadd.f32 %v1245_v51, %v3442_v48 }
 0x1b1   :  { %v1285_v56 = vsel %vm639_vm9, %v3461_v58, %v1284_v53  ;;  %v1286_v1 = vsel %vm639_vm9, %v1284_v53, %v3461_v58 }
 0x1b2   :  { %v686_v57 = vrot.slane %v682_v54, 4  ;;  %v687_v59 = vrot.slane %v683_v26, 4  ;;  %v1254_v0 = vpop.permute.xlu1 %1253 }
 0x1b3   :  { %v1294_v62 = vpop.permute.xlu0 %1293  ;;  %v1255_v58 = vsel %vm606_vm6, %v1252_v15, %v1254_v0  ;;  %v1256_v9 = vsel %vm606_vm6, %v1254_v0, %v1252_v15 }
 0x1b4   :  { %v1295_v29 = vsel %vm650_vm10, %v3463_v60, %v1294_v62  ;;  %v1296_v48 = vsel %vm650_vm10, %v1294_v62, %v3463_v60  ;;  %v3519_v2 = vadd.f32 %v686_v57, %v674_v20  ;;  %v3521_v10 = vadd.f32 %v687_v59, %v675_v21 }
 0x1b5   :  { %v1315_v8 = vadd.f32 %v1295_v29, %v1285_v56  ;;  %v1316_v11 = vadd.f32 %v1296_v48, %v1286_v1 }
 0x1b6   :  { %v1264_v16 = vpop.permute.xlu1 %1263 }
 0x1b7   :  { %v1321_v14 = vrot.slane %v1315_v8, 4  ;;  %v1322_v17 = vrot.slane %v1316_v11, 4  ;;  %v1265_v60 = vsel %vm617_vm7, %v1262_v31, %v1264_v16  ;;  %v1266_v18 = vsel %vm617_vm7, %v1264_v16, %v1262_v31  ;;  %v2554_v19 = vpop.permute.xlu0 %2553 }
 0x1b8   :  { %v1305_v20 = vadd.f32 %v1266_v18, %v1256_v9  ;;  %v1306_v30 = vadd.f32 %v1265_v60, %v1255_v58  ;;  %v3567_v11 = vstv %s3706_s4  ;;  %v3576_v9 = vstv %s3705_s3 }
 0x1b9   :  { %v1325_v21 = vadd.f32 %v1321_v14, %v1313_v12  ;;  %v1326_v28 = vadd.f32 %v1322_v17, %v1314_v13 }
 0x1ba   :  { %v1317_v22 = vadd.f32 %v1305_v20, %v1303_v35  ;;  %v1318_v23 = vadd.f32 %v1306_v30, %v1304_v55  ;;  %v2556_v25 = vpop.permute.xlu1 %2555 }
 0x1bb   :  { %v1329_v24 = vrot.slane %v1325_v21, 4  ;;  %v1330_v5 = vrot.slane %v1326_v28, 4  ;;  %v1920_v15 = vpop.permute.xlu0 %1919  ;;  %v2557_v12 = vsel %vm582_vm4, %v2554_v19, %v2556_v25  ;;  %v2558_v13 = vsel %vm582_vm4, %v2556_v25, %v2554_v19 }
 0x1bd   :  { %v3533_v27 = vadd.f32 %v1329_v24, %v1317_v22  ;;  %v3535_v33 = vadd.f32 %v1330_v5, %v1318_v23 }
 0x1be   :  { %v1922_v34 = vpop.permute.xlu1 %1921 }
 0x1bf   :  { %v1962_v36 = vpop.permute.xlu0 %1961  ;;  %v1923_v16 = vsel %vm582_vm4, %v1920_v15, %v1922_v34  ;;  %v3582_v14 = vsel %vm582_vm4, %v1922_v34, %v1920_v15 }
 0x1c2   :  { %v2596_v37 = vpop.permute.xlu1 %2595 }
 0x1c3   :  { %v1972_v39 = vpop.permute.xlu0 %1971 }
 0x1c6   :  { %v2606_v31 = vpop.permute.xlu1 %2605 }
 0x1c7   :  { %v1982_v40 = vpop.permute.xlu0 %1981 }
 0x1ca   :  { %v2616_v42 = vpop.permute.xlu1 %2615 }
 0x1cb   :  { %v2566_v43 = vpop.permute.xlu0 %2565 }
 0x1ce   :  { %v3537_v44 = vpop.permute.xlu1 %1299 }
 0x1cf   :  { %v2576_v45 = vpop.permute.xlu0 %2575 }
 0x1d2   :  { %v3539_v32 = vpop.permute.xlu1 %655 }
 0x1d3   :  { %v2586_v46 = vpop.permute.xlu0 %2585 }
 0x1d6   :  { %v1964_v47 = vpop.permute.xlu1 %1963 }
 0x1d7   :  { %v3541_v49 = vpop.permute.xlu0 %1931  ;;  %v1965_v26 = vsel %vm628_vm8, %v1962_v36, %v1964_v47  ;;  %v1966_v35 = vsel %vm628_vm8, %v1964_v47, %v1962_v36 }
 0x1d8   :  { %v1999_v59 = vrot.slane %v1965_v26, 4  ;;  %v2000_v61 = vrot.slane %v1966_v35, 4 }
 0x1da   :  { %v1974_v50 = vpop.permute.xlu1 %1973  ;;  %v2003_v17 = vadd.f32 %v1999_v59, %v3358_v6  ;;  %v2004_v60 = vadd.f32 %v2000_v61, %v3365_v7 }
 0x1db   :  { %v3543_v51 = vpop.permute.xlu0 %1941  ;;  %v1975_v63 = vsel %vm639_vm9, %v1972_v39, %v1974_v50  ;;  %v1976_v29 = vsel %vm639_vm9, %v1974_v50, %v1972_v39 }
 0x1de   :  { %v1984_v52 = vpop.permute.xlu1 %1983 }
 0x1df   :  { %v3545_v53 = vpop.permute.xlu0 %1951  ;;  %v1985_v57 = vsel %vm650_vm10, %v1982_v40, %v1984_v52  ;;  %v1986_v0 = vsel %vm650_vm10, %v1984_v52, %v1982_v40 }
 0x1e0   :  { %v2005_v1 = vadd.f32 %v1985_v57, %v1975_v63  ;;  %v2006_v58 = vadd.f32 %v1986_v0, %v1976_v29 }
 0x1e2   :  { %v2568_v54 = vpop.permute.xlu1 %2567  ;;  %v2011_v20 = vrot.slane %v2005_v1, 4  ;;  %v2012_v7 = vrot.slane %v2006_v58, 4 }
 0x1e3   :  { %v2598_v55 = vpop.permute.xlu0 %2597  ;;  %v2569_v34 = vsel %vm595_vm5, %v2566_v43, %v2568_v54  ;;  %v2570_v36 = vsel %vm595_vm5, %v2568_v54, %v2566_v43 }
 0x1e4   :  { %v2599_v48 = vsel %vm628_vm8, %v2596_v37, %v2598_v55  ;;  %v2600_v8 = vsel %vm628_vm8, %v2598_v55, %v2596_v37  ;;  %v2015_v35 = vadd.f32 %v2011_v20, %v2003_v17  ;;  %v2016_v57 = vadd.f32 %v2012_v7, %v2004_v60 }
 0x1e5   :  { %v2633_v19 = vrot.slane %v2599_v48, 4  ;;  %v2634_v30 = vrot.slane %v2600_v8, 4  ;;  %v2628_v59 = vadd.f32 %v2569_v34, %v2557_v12 }
 0x1e6   :  { %v2578_v56 = vpop.permute.xlu1 %2577 }
 0x1e7   :  { %v2608_v62 = vpop.permute.xlu0 %2607  ;;  %v2579_v37 = vsel %vm606_vm6, %v2576_v45, %v2578_v56  ;;  %v2580_v39 = vsel %vm606_vm6, %v2578_v56, %v2576_v45  ;;  %v2637_v40 = vadd.f32 %v2633_v19, %v3349_v3  ;;  %v2638_v52 = vadd.f32 %v2634_v30, %v3355_v4 }
 0x1e8   :  { %v2609_v21 = vsel %vm639_vm9, %v2606_v31, %v2608_v62  ;;  %v2610_v22 = vsel %vm639_vm9, %v2608_v62, %v2606_v31  ;;  %v2627_v45 = vadd.f32 %v2570_v36, %v2558_v13 }
 0x1ea   :  { %v2588_v18 = vpop.permute.xlu1 %2587 }
 0x1eb   :  { %v2618_v28 = vpop.permute.xlu0 %2617  ;;  %v2590_v23 = vsel %vm617_vm7, %v2588_v18, %v2586_v46  ;;  %v2589_v24 = vsel %vm617_vm7, %v2586_v46, %v2588_v18 }
 0x1ec   :  { %v2619_v25 = vsel %vm650_vm10, %v2616_v42, %v2618_v28  ;;  %v2620_v6 = vsel %vm650_vm10, %v2618_v28, %v2616_v42  ;;  %v2629_v42 = vadd.f32 %v2590_v23, %v2580_v39  ;;  %v2630_v26 = vadd.f32 %v2589_v24, %v2579_v37 }
 0x1ed   :  { %v2639_v5 = vadd.f32 %v2619_v25, %v2609_v21  ;;  %v2640_v15 = vadd.f32 %v2620_v6, %v2610_v22  ;;  %v2019_v6 = vrot.slane %v2015_v35, 4 }
 0x1ee   :  { %v1934_v31 = vpop.permute.xlu1 %1933  ;;  %v2641_v0 = vadd.f32 %v2629_v42, %v2627_v45  ;;  %v2642_v29 = vadd.f32 %v2630_v26, %v2628_v59 }
 0x1ef   :  { %v2645_v47 = vrot.slane %v2639_v5, 4  ;;  %v2646_v46 = vrot.slane %v2640_v15, 4  ;;  %v1298_v50 = vpop.permute.xlu0 %1297  ;;  %v1935_v56 = vsel %vm595_vm5, %v3541_v49, %v1934_v31 }
 0x1f0   :  { %v1301_v43 = vsel %vm657_vm11, %v1298_v50, %v3537_v44  ;;  %v1302_v54 = vsel %vm657_vm11, %v3537_v44, %v1298_v50  ;;  %v1994_v18 = vadd.f32 %v1935_v56, %v1923_v16  ;;  %v1365_v56 = vshrl.u32 %v580_v38, 7 }
 0x1f1   :  { %v1335_v55 = vadd.f32 %v3533_v27, %v1301_v43  ;;  %v1336_v3 = vadd.f32 %v3535_v33, %v1302_v54  ;;  %v2649_v61 = vadd.f32 %v2645_v47, %v2637_v40  ;;  %v2650_v63 = vadd.f32 %v2646_v46, %v2638_v52 }
 0x1f2   :  { %v1944_v4 = vpop.permute.xlu1 %1943  ;;  %v1936_v27 = vsel %vm595_vm5, %v1934_v31, %v3541_v49 }
 0x1f3   :  { %v1338_v1 = vadd.f32 %v3567_v11, %v1335_v55  ;;  %v1339_v44 = vadd.f32 %v3567_v11, %v1336_v3  ;;  %v654_v62 = vpop.permute.xlu0 %653  ;;  %v2653_v17 = vrot.slane %v2649_v61, 4  ;;  %v2654_v60 = vrot.slane %v2650_v63, 4 }
 0x1f4   :  { %v658_v33 = vsel %vm657_vm11, %v654_v62, %v3539_v32  ;;  %v659_v48 = vsel %vm657_vm11, %v3539_v32, %v654_v62  ;;  %v1945_v49 = vsel %vm606_vm6, %v3543_v51, %v1944_v4  ;;  %v1993_v28 = vadd.f32 %v1936_v27, %v3582_v14 }
 0x1f5   :  { %v2737_v8 = vmul.f32 -1.442695, %v1338_v1  ;;  %v2738_v12 = vmul.f32 -1.442695, %v1339_v44  ;;  %v692_v13 = vadd.f32 %v3519_v2, %v658_v33  ;;  %v693_v58 = vadd.f32 %v3521_v10, %v659_v48 }
 0x1f6   :  { %v1954_v20 = vpop.permute.xlu1 %1953  ;;  %v1946_v10 = vsel %vm606_vm6, %v1944_v4, %v3543_v51  ;;  %v2657_v24 = vadd.f32 %v2653_v17, %v2641_v0  ;;  %v2658_v5 = vadd.f32 %v2654_v60, %v2642_v29  ;;  %v1366_v44 = vsub.s32 0, %v1365_v56 }
 0x1f7   :  { %2842 = vpow2.f32 %v2737_v8  ;;  %v695_v19 = vadd.f32 %v3576_v9, %v692_v13  ;;  %v696_v30 = vadd.f32 %v3576_v9, %v693_v58  ;;  %v1955_v32 = vsel %vm617_vm7, %v3545_v53, %v1954_v20  ;;  %v2622_v2 = vpop.permute.xlu0 %2621 }
 0x1f8   :  { %2844 = vpow2.f32 %v2738_v12  ;;  %v1956_v16 = vsel %vm617_vm7, %v1954_v20, %v3545_v53  ;;  %v1996_v21 = vadd.f32 %v1955_v32, %v1945_v49  ;;  %v2020_v53 = vrot.slane %v2016_v57, 4 }
 0x1f9   :  { %v2735_v22 = vmul.f32 -1.442695, %v695_v19  ;;  %v2736_v23 = vmul.f32 -1.442695, %v696_v30  ;;  %v1995_v25 = vadd.f32 %v1956_v16, %v1946_v10  ;;  %v2874_v30 = vld [vmem:[%s3707_s5] sm:$0xff] }
 0x1fa   :  { %v2008_v7 = vadd.f32 %v1996_v21, %v1994_v18  ;;  %v2624_v15 = vpop.permute.xlu1 %2623  ;;  %v2876_v16 = vld [vmem:[%s3708_s6 + $0x8] sm:$0x3f] }
 0x1fb   :  { %2846 = vpow2.f32 %v2735_v22  ;;  %v2007_v34 = vadd.f32 %v1995_v25, %v1993_v28  ;;  %v2625_v51 = vsel %vm657_vm11, %v2622_v2, %v2624_v15  ;;  %v2626_v36 = vsel %vm657_vm11, %v2624_v15, %v2622_v2  ;;  %v1988_v39 = vpop.permute.xlu0 %1987  ;;  %v2875_v2 = vld [vmem:[%s3708_s6] sm:$0x3f] }
 0x1fc   :  { %2848 = vpow2.f32 %v2736_v23  ;;  %v2659_v37 = vadd.f32 %v2657_v24, %v2625_v51  ;;  %v2660_v14 = vadd.f32 %v2658_v5, %v2626_v36  ;;  %v2024_v47 = vadd.f32 %v2020_v53, %v2008_v7  ;;  %v2878_v36 = vld [vmem:[%s3708_s6 + $0x10] sm:$0x3f] }
 0x1fd   :  { %v2023_v42 = vadd.f32 %v2019_v6, %v2007_v34  ;;  %v2877_v34 = vld [vmem:[%s3707_s5 + $0x8] sm:$0xff] }
 0x1fe   :  { %v2661_v31 = vadd.f32 %v2659_v37, %v3567_v11  ;;  %v2662_v40 = vadd.f32 %v2660_v14, %v3567_v11  ;;  %v1990_v46 = vpop.permute.xlu1 %1989  ;;  %v2879_v37 = vld [vmem:[%s3708_s6 + $0x18] sm:$0x3f] }
 0x1ff   :  { %v1991_v50 = vsel %vm657_vm11, %v1988_v39, %v1990_v46  ;;  %v1992_v52 = vsel %vm657_vm11, %v1990_v46, %v1988_v39 }
 0x200   :  { %v2744_v26 = vmul.f32 -1.442695, %v2661_v31  ;;  %v2745_v43 = vmul.f32 -1.442695, %v2662_v40  ;;  %v2025_v54 = vadd.f32 %v2023_v42, %v1991_v50  ;;  %v2026_v35 = vadd.f32 %v2024_v47, %v1992_v52 }
 0x201   :  { %v2843_v45 = vpop.eup %2842 }
 0x202   :  { %v2845_v55 = vpop.eup %2844  ;;  %v1358_v3 = vadd.f32 1.0, %v2843_v45  ;;  %2850 = vpow2.f32 %v2744_v26  ;;  %v2027_v57 = vadd.f32 %v2025_v54, %v3576_v9  ;;  %v2028_v11 = vadd.f32 %v2026_v35, %v3576_v9 }
 0x203   :  { %v1359_v59 = vadd.f32 1.0, %v2845_v55  ;;  %2852 = vpow2.f32 %v2745_v43 }
 0x204   :  { %2854 = vrcp.f32 %v1358_v3  ;;  %v2742_v61 = vmul.f32 -1.442695, %v2027_v57  ;;  %v2743_v63 = vmul.f32 -1.442695, %v2028_v11 }
 0x205   :  { %v2847_v4 = vpop.eup %2846  ;;  %2856 = vrcp.f32 %v1359_v59 }
 0x206   :  { %v2849_v41 = vpop.eup %2848  ;;  %v1346_v0 = vadd.f32 1.0, %v2847_v4  ;;  %2858 = vpow2.f32 %v2742_v61 }
 0x207   :  { %v1347_v1 = vadd.f32 1.0, %v2849_v41  ;;  %2860 = vpow2.f32 %v2743_v63 }
 0x208   :  { %2862 = vrcp.f32 %v1346_v0 }
 0x209   :  { %2864 = vrcp.f32 %v1347_v1 }
 0x20c   :  { %v2851_v62 = vpop.eup %2850 }
 0x20d   :  { %v2853_v29 = vpop.eup %2852  ;;  %v2681_v9 = vadd.f32 1.0, %v2851_v62 }
 0x20e   :  { %v2855_v27 = vpop.eup %2854  ;;  %v2682_v33 = vadd.f32 1.0, %v2853_v29 }
 0x20f   :  { %v2857_v48 = vpop.eup %2856  ;;  %2866 = vrcp.f32 %v2681_v9  ;;  %v1367_v8 = vrot.slane %v2855_v27, %v1366_v44 }
 0x210   :  { %v2859_v12 = vpop.eup %2858  ;;  %2868 = vrcp.f32 %v2682_v33  ;;  %v1371_v13 = vrot.slane %v2857_v48, %v1366_v44 }
 0x211   :  { %v2861_v58 = vpop.eup %2860  ;;  %v2669_v17 = vadd.f32 1.0, %v2859_v12 }
 0x212   :  { %v2863_v60 = vpop.eup %2862  ;;  %v2670_v38 = vadd.f32 1.0, %v2861_v58  ;;  %v1374_v18 = vcombine.low %v1367_v8, %v1371_v13 }
 0x213   :  { %v2865_v49 = vpop.eup %2864  ;;  %v1381_v20 = vrot.slane %v2863_v60, %v1366_v44  ;;  %2870 = vrcp.f32 %v2669_v17 }
 0x214   :  { %v1385_v19 = vrot.slane %v2865_v49, %v1366_v44  ;;  %2872 = vrcp.f32 %v2670_v38  ;;  %v1376_v32 = vmul.f32 %v2874_v30, %v1374_v18 }
 0x215   :  { %v1386_v10 = vmul.f32 %v2875_v2, %v1381_v20 }
 0x216   :  { %v1387_v21 = vmul.f32 %v2876_v16, %v1385_v19  ;;  %1377 = vst [vmem:[#allocation4] sm:$0xff] %v1376_v32 }
 0x217   :  { %1388 = vst [vmem:[%s3710_s8] sm:$0x3f] %v1386_v10 }
 0x218   :  { %1389 = vst [vmem:[%s3710_s8 + $0x8] sm:$0x3f] %v1387_v21 }
 0x219   :  { %v2867_v28 = vpop.eup %2866 }
 0x21a   :  { %v2869_v22 = vpop.eup %2868  ;;  %v2690_v23 = vrot.slane %v2867_v28, %v1366_v44 }
 0x21b   :  { %v2694_v25 = vrot.slane %v2869_v22, %v1366_v44 }
 0x21d   :  { %v2871_v6 = vpop.eup %2870  ;;  %v2697_v7 = vcombine.low %v2690_v23, %v2694_v25 }
 0x21e   :  { %v2873_v24 = vpop.eup %2872  ;;  %v2705_v5 = vrot.slane %v2871_v6, %v1366_v44 }
 0x21f   :  { %v2709_v15 = vrot.slane %v2873_v24, %v1366_v44  ;;  %v2699_v51 = vmul.f32 %v2877_v34, %v2697_v7 }
 0x220   :  { %v2710_v53 = vmul.f32 %v2878_v36, %v2705_v5 }
 0x221   :  { %v2711_v14 = vmul.f32 %v2879_v37, %v2709_v15  ;;  %2701 = vst [vmem:[#allocation4 + $0x8] sm:$0xff] %v2699_v51 }
 0x222   :  { %2746 = vst [vmem:[%s3710_s8 + $0x10] sm:$0x3f] %v2710_v53 }
 0x223   :  { %2891 = shalt.err (!%p2888_p4)
}
 0x224   :  { %s2892_s16 = scalar_lea.hbm %s3709_s7, 256 }
 0x225   :  { %p2893_p5 = scmp.ne.s32.totalorder %s3709_s7, %s2892_s16  ;;  %p2896_p6 = scmp.lt.u32.totalorder %s2892_s16, %s3709_s7 }
 0x227   :  { %p2898_p7 = pnand %p2896_p6, %p2893_p5 }
 0x229   :  { %2901 = shalt.err (!%p2898_p7)
}
 0x22a   :  { %s2914_s1 = smov 128   ;;  %s2915_s3 = smov 8   ;;  %2747 = vst [vmem:[%s3710_s8 + $0x18] sm:$0x3f] %v2711_v14 }
 0x22b   :  { %2726 = dma.vmem_to_hbm [thread:$0]  %s2721_s27, 256, %s3709_s7, [#allocation5], %s2914_s1, %s2914_s1, %s2915_s3  }
 0x22c   :  { %2902 = dma.done.wait [#allocation5], 256  }
 0x22d   :  { %2903 = vsyncadd [#allocation5], 4294967040 }
 0x22e   :  { %2734 = vsyncpa [#allocation5], 1 }

</bundles_post_ra>
